<compile_context>
chip_gen: v7x
topology: tpu7x:2x2x1
jax: 0.10.0
libtpu: 0.0.40
codegen_flags: <defaults>
</compile_context>

<pallas_src>
import jax
import jax.numpy as jnp
from jax import lax
from jax.experimental import pallas as pl
from jax.experimental.pallas import tpu as pltpu


def _round_up(x, m):
    return (x + m - 1) // m * m


def _pad_gates_last(a, H, Hp):
    """(..., 4H) -> (..., 4*Hp): gate g's H columns land at g*Hp, zero padded."""
    if Hp == H:
        return a
    pads = [(0, 0)] * (a.ndim - 1) + [(0, Hp - H)]
    return jnp.concatenate(
        [jnp.pad(a[..., g * H:(g + 1) * H], pads) for g in range(4)], axis=-1)


# --------------------- Stage B: serial LSTM recurrence ---------------------
def _lstm_recurrence_kernel(gx_ref, h0_ref, whh_ref, y_ref, h_st, c_st):
    # gx_ref : (Tb, Bp, 4*Hp)  precomputed input gates (x@W_ih + h0-term + bias)
    # h0_ref : (Bp, Hp)        initial hidden state (padded)
    # whh_ref: (Hp, 4*Hp)      recurrent weights, pre-transposed, gate-padded
    # y_ref  : (Tb, Bp, Hp)    per-timestep hidden states
    @pl.when(pl.program_id(0) == 0)
    def _():
        h_st[...] = h0_ref[...]
        c_st[...] = jnp.zeros_like(c_st)

    Hp = h_st.shape[1]
    Tb = gx_ref.shape[0]
    whh = whh_ref[...]          # hoist the weight load out of the time loop

    def step(s, carry):
        h = h_st[...]
        # Only per-step MXU work: (Bp, Hp) x (Hp, 4*Hp)
        gates = gx_ref[s] + jnp.dot(h, whh, preferred_element_type=jnp.float32)
        # Gate slices are aligned to 128-lane tile boundaries (Hp % 128 == 0).
        i_g = jax.nn.sigmoid(gates[:, 0 * Hp:1 * Hp])
        f_g = jax.nn.sigmoid(gates[:, 1 * Hp:2 * Hp])
        g_g = jnp.tanh(gates[:, 2 * Hp:3 * Hp])
        o_g = jax.nn.sigmoid(gates[:, 3 * Hp:4 * Hp])
        c = f_g * c_st[...] + i_g * g_g
        h_new = o_g * jnp.tanh(c)
        c_st[...] = c
        h_st[...] = h_new
        y_ref[s] = h_new
        return carry

    lax.fori_loop(0, Tb, step, 0, unroll=True)


# --------------------- Stage C: parallel vocab projection ---------------------
def _proj_kernel(y_ref, waff_ref, const_ref, out_ref):
    # y_ref    : (Tm, Bp, Hp)
    # waff_ref : (Hp, Vt)      rows of W_aff corresponding to y (zero padded)
    # const_ref: (Bp, Vt)      h0 @ W_aff[H:] + b_aff (constant over T)
    # out_ref  : (Tm, Bp, Vt)
    Tm, Bp, Hp = y_ref.shape
    Vt = waff_ref.shape[1]
    # Merging (Tm, Bp) is layout-preserving because Bp % 8 == 0.
    y2 = y_ref[...].reshape(Tm * Bp, Hp)
    out2 = jnp.dot(y2, waff_ref[...], preferred_element_type=jnp.float32)
    out_ref[...] = out2.reshape(Tm, Bp, Vt) + const_ref[...]


def decoder_forward(xs, h, params, *, t_block=4, v_block=128):
    """xs: (B, T) int32 token ids.  h: (1, B, H) float32 (PyTorch LSTM h0 shape)."""
    emb_w, w_ih, w_hh, b_lstm, w_aff, b_aff = (
        params["emb_w"], params["w_ih"], params["w_hh"],
        params["b_lstm"], params["w_aff"], params["b_aff"])

    B, T = xs.shape
    H = h.shape[2]
    W = emb_w.shape[1]
    V = w_aff.shape[1]

    # Padded, lane/sublane-aligned kernel shapes.
    Hp = _round_up(H, 128)
    Vp = _round_up(V, 128)
    Bp = _round_up(B, 8)
    Tb = min(t_block, T)
    Tpad = _round_up(T, Tb)
    Vt = v_block if (Vp % v_block == 0) else 128

    h_b = h[0]                                                     # (B, H)

    # --- Stage A (XLA): embedding gather + hoisted input transform. ---
    emb = jnp.take(emb_w, xs, axis=0)                              # (B, T, W)
    bias_eff = h_b @ w_ih[W:] + b_lstm[0]                          # (B, 4H), const over T
    gates_x = jnp.einsum('btw,wg->btg', emb, w_ih[:W],
                         preferred_element_type=jnp.float32)
    gates_x = gates_x + bias_eff[:, None, :]                       # (B, T, 4H)
    gates_x = _pad_gates_last(gates_x, H, Hp)                      # (B, T, 4*Hp)
    gates_x = jnp.transpose(gates_x, (1, 0, 2))                    # (T, B, 4*Hp)
    gates_x = jnp.pad(gates_x, ((0, Tpad - T), (0, Bp - B), (0, 0)))

    h0_p = jnp.pad(h_b, ((0, Bp - B), (0, Hp - H)))                # (Bp, Hp)
    whh_p = _pad_gates_last(jnp.pad(w_hh, ((0, Hp - H), (0, 0))), H, Hp)  # (Hp, 4*Hp)

    # --- Stage B (Pallas): serial recurrence, Tb timesteps per grid step. ---
    y_p = pl.pallas_call(
        _lstm_recurrence_kernel,
        out_shape=jax.ShapeDtypeStruct((Tpad, Bp, Hp), jnp.float32),
        grid_spec=pltpu.PrefetchScalarGridSpec(
            num_scalar_prefetch=0,
            grid=(Tpad // Tb,),
            in_specs=[
                pl.BlockSpec((Tb, Bp, 4 * Hp), lambda t: (t, 0, 0)),  # gates_x block
                pl.BlockSpec((Bp, Hp), lambda t: (0, 0)),             # h0
                pl.BlockSpec((Hp, 4 * Hp), lambda t: (0, 0)),         # W_hh^T
            ],
            out_specs=pl.BlockSpec((Tb, Bp, Hp), lambda t: (t, 0, 0)),
            scratch_shapes=[
                pltpu.VMEM((Bp, Hp), jnp.float32),   # h state (carried across grid)
                pltpu.VMEM((Bp, Hp), jnp.float32),   # c state (carried across grid)
            ],
        ),
        compiler_params=pltpu.CompilerParams(
            dimension_semantics=("arbitrary",)),      # sequential recurrence over T
    )(gates_x, h0_p, whh_p)

    # --- Stage C (Pallas): lane-dense, V-tiled vocab projection. ---
    waff_y = jnp.pad(w_aff[:H], ((0, Hp - H), (0, Vp - V)))        # (Hp, Vp), zero pad
    const = h_b @ w_aff[H:] + b_aff[0]                             # (B, V), const over T
    const_p = jnp.pad(const, ((0, Bp - B), (0, Vp - V)))           # (Bp, Vp)

    out_p = pl.pallas_call(
        _proj_kernel,
        out_shape=jax.ShapeDtypeStruct((Tpad, Bp, Vp), jnp.float32),
        grid_spec=pltpu.PrefetchScalarGridSpec(
            num_scalar_prefetch=0,
            grid=(Tpad // Tb, Vp // Vt),
            in_specs=[
                pl.BlockSpec((Tb, Bp, Hp), lambda t, v: (t, 0, 0)),
                pl.BlockSpec((Hp, Vt), lambda t, v: (0, v)),
                pl.BlockSpec((Bp, Vt), lambda t, v: (0, v)),
            ],
            out_specs=pl.BlockSpec((Tb, Bp, Vt), lambda t, v: (t, 0, v)),
        ),
        compiler_params=pltpu.CompilerParams(
            dimension_semantics=("parallel", "parallel")),
    )(y_p, waff_y, const_p)

    out = out_p[:T, :B, :V]                                        # strip padding
    return jnp.transpose(out, (1, 0, 2))                           # (B, T, V)


def decoder_reference(xs, h, params):
    """Pure-JAX reference matching PyTorch LSTM/Linear semantics."""
    emb_w, w_ih, w_hh, b_lstm, w_aff, b_aff = (
        params["emb_w"], params["w_ih"], params["w_hh"],
        params["b_lstm"], params["w_aff"], params["b_aff"])
    B, T = xs.shape
    H = h.shape[2]
    emb = jnp.take(emb_w, xs, axis=0)
    h_b = h[0]
    h_for_cat = jnp.broadcast_to(h_b[:, None, :], (B, T, H))
    xcat = jnp.concatenate([emb, h_for_cat], axis=2)

    def step(carry, x_t):
        h_t, c_t = carry
        gates = x_t @ w_ih + h_t @ w_hh + b_lstm[0]
        i_g = jax.nn.sigmoid(gates[:, 0 * H:1 * H])
        f_g = jax.nn.sigmoid(gates[:, 1 * H:2 * H])
        g_g = jnp.tanh(gates[:, 2 * H:3 * H])
        o_g = jax.nn.sigmoid(gates[:, 3 * H:4 * H])
        c_n = f_g * c_t + i_g * g_g
        h_n = o_g * jnp.tanh(c_n)
        return (h_n, c_n), h_n

    (_, _), ys = jax.lax.scan(step, (h_b, jnp.zeros_like(h_b)),
                              jnp.transpose(xcat, (1, 0, 2)))
    y = jnp.transpose(ys, (1, 0, 2))                               # (B, T, H)
    y_cat_h = jnp.concatenate([y, h_for_cat], axis=2)              # (B, T, 2H)
    return y_cat_h @ w_aff + b_aff[0]


def make_params(key, vocab_size, wordvec_size, hidden_size):
    V, W, H = vocab_size, wordvec_size, hidden_size
    ks = jax.random.split(key, 7)

    def xavier(k, shape, fan_in, fan_out):
        bound = (6.0 / (fan_in + fan_out)) ** 0.5
        return jax.random.uniform(k, shape, jnp.float32, -bound, bound)

    def lstm_u(k, shape):
        bound = 1.0 / (H ** 0.5)
        return jax.random.uniform(k, shape, jnp.float32, -bound, bound)

    return {
        # Embedding weight (V, W), xavier_uniform_ as in the module.
        "emb_w": xavier(ks[0], (V, W), W, V),
        # LSTM weights stored pre-transposed: (in, 4H) / (H, 4H); gate order i,f,g,o.
        "w_ih": lstm_u(ks[1], (W + H, 4 * H)),
        "w_hh": lstm_u(ks[2], (H, 4 * H)),
        "b_lstm": lstm_u(ks[3], (1, 4 * H)) + lstm_u(ks[4], (1, 4 * H)),  # b_ih + b_hh
        # Affine weight pre-transposed: (2H, V), xavier_uniform_; bias default init.
        "w_aff": xavier(ks[5], (2 * H, V), 2 * H, V),
        "b_aff": jax.random.uniform(ks[6], (1, V), jnp.float32,
                                    -1.0 / (2 * H) ** 0.5, 1.0 / (2 * H) ** 0.5),
    }


if __name__ == "__main__":
    VOCAB, WORDVEC, HIDDEN = 40, 16, 32
    B, T = 4, 8

    key = jax.random.PRNGKey(0)
    k_p, k_x, k_h = jax.random.split(key, 3)

    params = make_params(k_p, VOCAB, WORDVEC, HIDDEN)
    xs = jax.random.randint(k_x, (B, T), 0, VOCAB, dtype=jnp.int32)
    h0 = jax.random.normal(k_h, (1, B, HIDDEN), jnp.float32)

    fwd = jax.jit(decoder_forward)
    y = jax.block_until_ready(fwd(xs, h0, params))
    y_ref = jax.block_until_ready(decoder_reference(xs, h0, params))

    assert y.shape == (B, T, VOCAB)
    max_err = float(jnp.max(jnp.abs(y - y_ref)))
    assert max_err < 1e-2, f"mismatch vs reference: {max_err}"

    print("KERNEL_OK")
</pallas_src>

<mosaic_0001>
module attributes {stable_mosaic.version = 11 : i64} {
  func.func @_lstm_recurrence_kernel(%arg0: i32, %arg1: memref<4x8x512xf32, #tpu.memory_space<vmem>>, %arg2: memref<8x128xf32, #tpu.memory_space<vmem>>, %arg3: memref<128x512xf32, #tpu.memory_space<vmem>>, %arg4: memref<4x8x128xf32, #tpu.memory_space<vmem>>, %arg5: memref<8x128xf32, #tpu.memory_space<vmem>>, %arg6: memref<8x128xf32, #tpu.memory_space<vmem>>) attributes {dimension_semantics = [#tpu.dimension_semantics<arbitrary>], iteration_bounds = array<i64: 2>, scalar_prefetch = 0 : i64, scratch_operands = 2 : i64, tpu.core_type = #tpu.core_type<tc>, window_params = [{transform_indices = @transform_0, window_bounds = array<i64: 4, 8, 512>}, {pipeline_mode = #tpu.pipeline_mode<synchronous>, transform_indices = @transform_1, window_bounds = array<i64: 8, 128>}, {pipeline_mode = #tpu.pipeline_mode<synchronous>, transform_indices = @transform_2, window_bounds = array<i64: 128, 512>}, {transform_indices = @transform_3, window_bounds = array<i64: 4, 8, 128>}]} {
    %c0_i32 = arith.constant 0 : i32
    %0 = arith.cmpi eq, %arg0, %c0_i32 : i32
    %1 = arith.extui %0 : i1 to i32
    %c0_i32_0 = arith.constant 0 : i32
    %2 = arith.cmpi ne, %1, %c0_i32_0 : i32
    scf.if %2 {
      %c0_66 = arith.constant 0 : index
      %c0_67 = arith.constant 0 : index
      %156 = vector.load %arg2[%c0_66, %c0_67] : memref<8x128xf32, #tpu.memory_space<vmem>>, vector<8x128xf32>
      %c0_68 = arith.constant 0 : index
      %c0_69 = arith.constant 0 : index
      %157 = vector.load %arg5[%c0_68, %c0_69] : memref<8x128xf32, #tpu.memory_space<vmem>>, vector<8x128xf32>
      tpu.vector_store %arg5[%c0_68, %c0_69], %156 {strides = array<i32>} : memref<8x128xf32, #tpu.memory_space<vmem>>, vector<8x128xf32>,
      %cst_70 = arith.constant 0.000000e+00 : f32
      %158 = vector.broadcast %cst_70 : f32 to vector<8x128xf32>
      %c0_71 = arith.constant 0 : index
      %c0_72 = arith.constant 0 : index
      %159 = vector.load %arg6[%c0_71, %c0_72] : memref<8x128xf32, #tpu.memory_space<vmem>>, vector<8x128xf32>
      tpu.vector_store %arg6[%c0_71, %c0_72], %158 {strides = array<i32>} : memref<8x128xf32, #tpu.memory_space<vmem>>, vector<8x128xf32>,
    } else {
    }
    %c0 = arith.constant 0 : index
    %c0_1 = arith.constant 0 : index
    %3 = vector.load %arg3[%c0, %c0_1] : memref<128x512xf32, #tpu.memory_space<vmem>>, vector<128x512xf32>
    %c0_i32_2 = arith.constant 0 : i32
    %c0_3 = arith.constant 0 : index
    %c0_4 = arith.constant 0 : index
    %4 = vector.load %arg5[%c0_3, %c0_4] : memref<8x128xf32, #tpu.memory_space<vmem>>, vector<8x128xf32>
    %5 = arith.index_cast %c0_i32_2 : i32 to index
    %c0_5 = arith.constant 0 : index
    %c0_6 = arith.constant 0 : index
    %6 = vector.load %arg1[%5, %c0_5, %c0_6] : memref<4x8x512xf32, #tpu.memory_space<vmem>>, vector<1x8x512xf32>
    %7 = vector.shape_cast %6 : vector<1x8x512xf32> to vector<8x512xf32>
    %cst = arith.constant dense<0.000000e+00> : vector<8x512xf32>
    %8 = tpu.matmul %4, %3, %cst {dimension_numbers = #tpu.dot_dimension_numbers<[1], [0], [0], [1], [0, 0, 1, 1], [], []>} : vector<8x128xf32>, vector<128x512xf32>, vector<8x512xf32> -> vector<8x512xf32>
    %9 = arith.addf %7, %8 : vector<8x512xf32>
    %10 = vector.extract_strided_slice %9 {offsets = [0, 0], sizes = [8, 128], strides = [1, 1]} : vector<8x512xf32> to vector<8x128xf32>
    %11 = arith.negf %10 : vector<8x128xf32>
    %12 = math.exp %11 : vector<8x128xf32>
    %cst_7 = arith.constant 1.000000e+00 : f32
    %13 = vector.broadcast %cst_7 : f32 to vector<8x128xf32>
    %14 = arith.addf %13, %12 : vector<8x128xf32>
    %15 = arith.divf %13, %14 : vector<8x128xf32>
    %16 = vector.extract_strided_slice %9 {offsets = [0, 128], sizes = [8, 128], strides = [1, 1]} : vector<8x512xf32> to vector<8x128xf32>
    %17 = arith.negf %16 : vector<8x128xf32>
    %18 = math.exp %17 : vector<8x128xf32>
    %cst_8 = arith.constant 1.000000e+00 : f32
    %19 = vector.broadcast %cst_8 : f32 to vector<8x128xf32>
    %20 = arith.addf %19, %18 : vector<8x128xf32>
    %21 = arith.divf %19, %20 : vector<8x128xf32>
    %22 = vector.extract_strided_slice %9 {offsets = [0, 256], sizes = [8, 128], strides = [1, 1]} : vector<8x512xf32> to vector<8x128xf32>
    %23 = math.tanh %22 : vector<8x128xf32>
    %24 = vector.extract_strided_slice %9 {offsets = [0, 384], sizes = [8, 128], strides = [1, 1]} : vector<8x512xf32> to vector<8x128xf32>
    %25 = arith.negf %24 : vector<8x128xf32>
    %26 = math.exp %25 : vector<8x128xf32>
    %cst_9 = arith.constant 1.000000e+00 : f32
    %27 = vector.broadcast %cst_9 : f32 to vector<8x128xf32>
    %28 = arith.addf %27, %26 : vector<8x128xf32>
    %29 = arith.divf %27, %28 : vector<8x128xf32>
    %c0_10 = arith.constant 0 : index
    %c0_11 = arith.constant 0 : index
    %30 = vector.load %arg6[%c0_10, %c0_11] : memref<8x128xf32, #tpu.memory_space<vmem>>, vector<8x128xf32>
    %31 = arith.mulf %21, %30 : vector<8x128xf32>
    %32 = arith.mulf %15, %23 : vector<8x128xf32>
    %33 = arith.addf %31, %32 : vector<8x128xf32>
    %34 = math.tanh %33 : vector<8x128xf32>
    %35 = arith.mulf %29, %34 : vector<8x128xf32>
    %c0_12 = arith.constant 0 : index
    %c0_13 = arith.constant 0 : index
    %36 = vector.load %arg6[%c0_12, %c0_13] : memref<8x128xf32, #tpu.memory_space<vmem>>, vector<8x128xf32>
    tpu.vector_store %arg6[%c0_12, %c0_13], %33 {strides = array<i32>} : memref<8x128xf32, #tpu.memory_space<vmem>>, vector<8x128xf32>,
    %c0_14 = arith.constant 0 : index
    %c0_15 = arith.constant 0 : index
    %37 = vector.load %arg5[%c0_14, %c0_15] : memref<8x128xf32, #tpu.memory_space<vmem>>, vector<8x128xf32>
    tpu.vector_store %arg5[%c0_14, %c0_15], %35 {strides = array<i32>} : memref<8x128xf32, #tpu.memory_space<vmem>>, vector<8x128xf32>,
    %38 = arith.index_cast %c0_i32_2 : i32 to index
    %c0_16 = arith.constant 0 : index
    %c0_17 = arith.constant 0 : index
    %39 = vector.load %arg4[%38, %c0_16, %c0_17] : memref<4x8x128xf32, #tpu.memory_space<vmem>>, vector<1x8x128xf32>
    %40 = vector.shape_cast %39 : vector<1x8x128xf32> to vector<8x128xf32>
    %41 = vector.shape_cast %35 : vector<8x128xf32> to vector<1x8x128xf32>
    tpu.vector_store %arg4[%38, %c0_16, %c0_17], %41 {strides = array<i32>} : memref<4x8x128xf32, #tpu.memory_space<vmem>>, vector<1x8x128xf32>,
    %c1_i32 = arith.constant 1 : i32
    %c0_18 = arith.constant 0 : index
    %c0_19 = arith.constant 0 : index
    %42 = vector.load %arg5[%c0_18, %c0_19] : memref<8x128xf32, #tpu.memory_space<vmem>>, vector<8x128xf32>
    %43 = arith.index_cast %c1_i32 : i32 to index
    %c0_20 = arith.constant 0 : index
    %c0_21 = arith.constant 0 : index
    %44 = vector.load %arg1[%43, %c0_20, %c0_21] : memref<4x8x512xf32, #tpu.memory_space<vmem>>, vector<1x8x512xf32>
    %45 = vector.shape_cast %44 : vector<1x8x512xf32> to vector<8x512xf32>
    %cst_22 = arith.constant dense<0.000000e+00> : vector<8x512xf32>
    %46 = tpu.matmul %42, %3, %cst_22 {dimension_numbers = #tpu.dot_dimension_numbers<[1], [0], [0], [1], [0, 0, 1, 1], [], []>} : vector<8x128xf32>, vector<128x512xf32>, vector<8x512xf32> -> vector<8x512xf32>
    %47 = arith.addf %45, %46 : vector<8x512xf32>
    %48 = vector.extract_strided_slice %47 {offsets = [0, 0], sizes = [8, 128], strides = [1, 1]} : vector<8x512xf32> to vector<8x128xf32>
    %49 = arith.negf %48 : vector<8x128xf32>
    %50 = math.exp %49 : vector<8x128xf32>
    %cst_23 = arith.constant 1.000000e+00 : f32
    %51 = vector.broadcast %cst_23 : f32 to vector<8x128xf32>
    %52 = arith.addf %51, %50 : vector<8x128xf32>
    %53 = arith.divf %51, %52 : vector<8x128xf32>
    %54 = vector.extract_strided_slice %47 {offsets = [0, 128], sizes = [8, 128], strides = [1, 1]} : vector<8x512xf32> to vector<8x128xf32>
    %55 = arith.negf %54 : vector<8x128xf32>
    %56 = math.exp %55 : vector<8x128xf32>
    %cst_24 = arith.constant 1.000000e+00 : f32
    %57 = vector.broadcast %cst_24 : f32 to vector<8x128xf32>
    %58 = arith.addf %57, %56 : vector<8x128xf32>
    %59 = arith.divf %57, %58 : vector<8x128xf32>
    %60 = vector.extract_strided_slice %47 {offsets = [0, 256], sizes = [8, 128], strides = [1, 1]} : vector<8x512xf32> to vector<8x128xf32>
    %61 = math.tanh %60 : vector<8x128xf32>
    %62 = vector.extract_strided_slice %47 {offsets = [0, 384], sizes = [8, 128], strides = [1, 1]} : vector<8x512xf32> to vector<8x128xf32>
    %63 = arith.negf %62 : vector<8x128xf32>
    %64 = math.exp %63 : vector<8x128xf32>
    %cst_25 = arith.constant 1.000000e+00 : f32
    %65 = vector.broadcast %cst_25 : f32 to vector<8x128xf32>
    %66 = arith.addf %65, %64 : vector<8x128xf32>
    %67 = arith.divf %65, %66 : vector<8x128xf32>
    %c0_26 = arith.constant 0 : index
    %c0_27 = arith.constant 0 : index
    %68 = vector.load %arg6[%c0_26, %c0_27] : memref<8x128xf32, #tpu.memory_space<vmem>>, vector<8x128xf32>
    %69 = arith.mulf %59, %68 : vector<8x128xf32>
    %70 = arith.mulf %53, %61 : vector<8x128xf32>
    %71 = arith.addf %69, %70 : vector<8x128xf32>
    %72 = math.tanh %71 : vector<8x128xf32>
    %73 = arith.mulf %67, %72 : vector<8x128xf32>
    %c0_28 = arith.constant 0 : index
    %c0_29 = arith.constant 0 : index
    %74 = vector.load %arg6[%c0_28, %c0_29] : memref<8x128xf32, #tpu.memory_space<vmem>>, vector<8x128xf32>
    tpu.vector_store %arg6[%c0_28, %c0_29], %71 {strides = array<i32>} : memref<8x128xf32, #tpu.memory_space<vmem>>, vector<8x128xf32>,
    %c0_30 = arith.constant 0 : index
    %c0_31 = arith.constant 0 : index
    %75 = vector.load %arg5[%c0_30, %c0_31] : memref<8x128xf32, #tpu.memory_space<vmem>>, vector<8x128xf32>
    tpu.vector_store %arg5[%c0_30, %c0_31], %73 {strides = array<i32>} : memref<8x128xf32, #tpu.memory_space<vmem>>, vector<8x128xf32>,
    %76 = arith.index_cast %c1_i32 : i32 to index
    %c0_32 = arith.constant 0 : index
    %c0_33 = arith.constant 0 : index
    %77 = vector.load %arg4[%76, %c0_32, %c0_33] : memref<4x8x128xf32, #tpu.memory_space<vmem>>, vector<1x8x128xf32>
    %78 = vector.shape_cast %77 : vector<1x8x128xf32> to vector<8x128xf32>
    %79 = vector.shape_cast %73 : vector<8x128xf32> to vector<1x8x128xf32>
    tpu.vector_store %arg4[%76, %c0_32, %c0_33], %79 {strides = array<i32>} : memref<4x8x128xf32, #tpu.memory_space<vmem>>, vector<1x8x128xf32>,
    %c2_i32 = arith.constant 2 : i32
    %c0_34 = arith.constant 0 : index
    %c0_35 = arith.constant 0 : index
    %80 = vector.load %arg5[%c0_34, %c0_35] : memref<8x128xf32, #tpu.memory_space<vmem>>, vector<8x128xf32>
    %81 = arith.index_cast %c2_i32 : i32 to index
    %c0_36 = arith.constant 0 : index
    %c0_37 = arith.constant 0 : index
    %82 = vector.load %arg1[%81, %c0_36, %c0_37] : memref<4x8x512xf32, #tpu.memory_space<vmem>>, vector<1x8x512xf32>
    %83 = vector.shape_cast %82 : vector<1x8x512xf32> to vector<8x512xf32>
    %cst_38 = arith.constant dense<0.000000e+00> : vector<8x512xf32>
    %84 = tpu.matmul %80, %3, %cst_38 {dimension_numbers = #tpu.dot_dimension_numbers<[1], [0], [0], [1], [0, 0, 1, 1], [], []>} : vector<8x128xf32>, vector<128x512xf32>, vector<8x512xf32> -> vector<8x512xf32>
    %85 = arith.addf %83, %84 : vector<8x512xf32>
    %86 = vector.extract_strided_slice %85 {offsets = [0, 0], sizes = [8, 128], strides = [1, 1]} : vector<8x512xf32> to vector<8x128xf32>
    %87 = arith.negf %86 : vector<8x128xf32>
    %88 = math.exp %87 : vector<8x128xf32>
    %cst_39 = arith.constant 1.000000e+00 : f32
    %89 = vector.broadcast %cst_39 : f32 to vector<8x128xf32>
    %90 = arith.addf %89, %88 : vector<8x128xf32>
    %91 = arith.divf %89, %90 : vector<8x128xf32>
    %92 = vector.extract_strided_slice %85 {offsets = [0, 128], sizes = [8, 128], strides = [1, 1]} : vector<8x512xf32> to vector<8x128xf32>
    %93 = arith.negf %92 : vector<8x128xf32>
    %94 = math.exp %93 : vector<8x128xf32>
    %cst_40 = arith.constant 1.000000e+00 : f32
    %95 = vector.broadcast %cst_40 : f32 to vector<8x128xf32>
    %96 = arith.addf %95, %94 : vector<8x128xf32>
    %97 = arith.divf %95, %96 : vector<8x128xf32>
    %98 = vector.extract_strided_slice %85 {offsets = [0, 256], sizes = [8, 128], strides = [1, 1]} : vector<8x512xf32> to vector<8x128xf32>
    %99 = math.tanh %98 : vector<8x128xf32>
    %100 = vector.extract_strided_slice %85 {offsets = [0, 384], sizes = [8, 128], strides = [1, 1]} : vector<8x512xf32> to vector<8x128xf32>
    %101 = arith.negf %100 : vector<8x128xf32>
    %102 = math.exp %101 : vector<8x128xf32>
    %cst_41 = arith.constant 1.000000e+00 : f32
    %103 = vector.broadcast %cst_41 : f32 to vector<8x128xf32>
    %104 = arith.addf %103, %102 : vector<8x128xf32>
    %105 = arith.divf %103, %104 : vector<8x128xf32>
    %c0_42 = arith.constant 0 : index
    %c0_43 = arith.constant 0 : index
    %106 = vector.load %arg6[%c0_42, %c0_43] : memref<8x128xf32, #tpu.memory_space<vmem>>, vector<8x128xf32>
    %107 = arith.mulf %97, %106 : vector<8x128xf32>
    %108 = arith.mulf %91, %99 : vector<8x128xf32>
    %109 = arith.addf %107, %108 : vector<8x128xf32>
    %110 = math.tanh %109 : vector<8x128xf32>
    %111 = arith.mulf %105, %110 : vector<8x128xf32>
    %c0_44 = arith.constant 0 : index
    %c0_45 = arith.constant 0 : index
    %112 = vector.load %arg6[%c0_44, %c0_45] : memref<8x128xf32, #tpu.memory_space<vmem>>, vector<8x128xf32>
    tpu.vector_store %arg6[%c0_44, %c0_45], %109 {strides = array<i32>} : memref<8x128xf32, #tpu.memory_space<vmem>>, vector<8x128xf32>,
    %c0_46 = arith.constant 0 : index
    %c0_47 = arith.constant 0 : index
    %113 = vector.load %arg5[%c0_46, %c0_47] : memref<8x128xf32, #tpu.memory_space<vmem>>, vector<8x128xf32>
    tpu.vector_store %arg5[%c0_46, %c0_47], %111 {strides = array<i32>} : memref<8x128xf32, #tpu.memory_space<vmem>>, vector<8x128xf32>,
    %114 = arith.index_cast %c2_i32 : i32 to index
    %c0_48 = arith.constant 0 : index
    %c0_49 = arith.constant 0 : index
    %115 = vector.load %arg4[%114, %c0_48, %c0_49] : memref<4x8x128xf32, #tpu.memory_space<vmem>>, vector<1x8x128xf32>
    %116 = vector.shape_cast %115 : vector<1x8x128xf32> to vector<8x128xf32>
    %117 = vector.shape_cast %111 : vector<8x128xf32> to vector<1x8x128xf32>
    tpu.vector_store %arg4[%114, %c0_48, %c0_49], %117 {strides = array<i32>} : memref<4x8x128xf32, #tpu.memory_space<vmem>>, vector<1x8x128xf32>,
    %c3_i32 = arith.constant 3 : i32
    %c0_50 = arith.constant 0 : index
    %c0_51 = arith.constant 0 : index
    %118 = vector.load %arg5[%c0_50, %c0_51] : memref<8x128xf32, #tpu.memory_space<vmem>>, vector<8x128xf32>
    %119 = arith.index_cast %c3_i32 : i32 to index
    %c0_52 = arith.constant 0 : index
    %c0_53 = arith.constant 0 : index
    %120 = vector.load %arg1[%119, %c0_52, %c0_53] : memref<4x8x512xf32, #tpu.memory_space<vmem>>, vector<1x8x512xf32>
    %121 = vector.shape_cast %120 : vector<1x8x512xf32> to vector<8x512xf32>
    %cst_54 = arith.constant dense<0.000000e+00> : vector<8x512xf32>
    %122 = tpu.matmul %118, %3, %cst_54 {dimension_numbers = #tpu.dot_dimension_numbers<[1], [0], [0], [1], [0, 0, 1, 1], [], []>} : vector<8x128xf32>, vector<128x512xf32>, vector<8x512xf32> -> vector<8x512xf32>
    %123 = arith.addf %121, %122 : vector<8x512xf32>
    %124 = vector.extract_strided_slice %123 {offsets = [0, 0], sizes = [8, 128], strides = [1, 1]} : vector<8x512xf32> to vector<8x128xf32>
    %125 = arith.negf %124 : vector<8x128xf32>
    %126 = math.exp %125 : vector<8x128xf32>
    %cst_55 = arith.constant 1.000000e+00 : f32
    %127 = vector.broadcast %cst_55 : f32 to vector<8x128xf32>
    %128 = arith.addf %127, %126 : vector<8x128xf32>
    %129 = arith.divf %127, %128 : vector<8x128xf32>
    %130 = vector.extract_strided_slice %123 {offsets = [0, 128], sizes = [8, 128], strides = [1, 1]} : vector<8x512xf32> to vector<8x128xf32>
    %131 = arith.negf %130 : vector<8x128xf32>
    %132 = math.exp %131 : vector<8x128xf32>
    %cst_56 = arith.constant 1.000000e+00 : f32
    %133 = vector.broadcast %cst_56 : f32 to vector<8x128xf32>
    %134 = arith.addf %133, %132 : vector<8x128xf32>
    %135 = arith.divf %133, %134 : vector<8x128xf32>
    %136 = vector.extract_strided_slice %123 {offsets = [0, 256], sizes = [8, 128], strides = [1, 1]} : vector<8x512xf32> to vector<8x128xf32>
    %137 = math.tanh %136 : vector<8x128xf32>
    %138 = vector.extract_strided_slice %123 {offsets = [0, 384], sizes = [8, 128], strides = [1, 1]} : vector<8x512xf32> to vector<8x128xf32>
    %139 = arith.negf %138 : vector<8x128xf32>
    %140 = math.exp %139 : vector<8x128xf32>
    %cst_57 = arith.constant 1.000000e+00 : f32
    %141 = vector.broadcast %cst_57 : f32 to vector<8x128xf32>
    %142 = arith.addf %141, %140 : vector<8x128xf32>
    %143 = arith.divf %141, %142 : vector<8x128xf32>
    %c0_58 = arith.constant 0 : index
    %c0_59 = arith.constant 0 : index
    %144 = vector.load %arg6[%c0_58, %c0_59] : memref<8x128xf32, #tpu.memory_space<vmem>>, vector<8x128xf32>
    %145 = arith.mulf %135, %144 : vector<8x128xf32>
    %146 = arith.mulf %129, %137 : vector<8x128xf32>
    %147 = arith.addf %145, %146 : vector<8x128xf32>
    %148 = math.tanh %147 : vector<8x128xf32>
    %149 = arith.mulf %143, %148 : vector<8x128xf32>
    %c0_60 = arith.constant 0 : index
    %c0_61 = arith.constant 0 : index
    %150 = vector.load %arg6[%c0_60, %c0_61] : memref<8x128xf32, #tpu.memory_space<vmem>>, vector<8x128xf32>
    tpu.vector_store %arg6[%c0_60, %c0_61], %147 {strides = array<i32>} : memref<8x128xf32, #tpu.memory_space<vmem>>, vector<8x128xf32>,
    %c0_62 = arith.constant 0 : index
    %c0_63 = arith.constant 0 : index
    %151 = vector.load %arg5[%c0_62, %c0_63] : memref<8x128xf32, #tpu.memory_space<vmem>>, vector<8x128xf32>
    tpu.vector_store %arg5[%c0_62, %c0_63], %149 {strides = array<i32>} : memref<8x128xf32, #tpu.memory_space<vmem>>, vector<8x128xf32>,
    %152 = arith.index_cast %c3_i32 : i32 to index
    %c0_64 = arith.constant 0 : index
    %c0_65 = arith.constant 0 : index
    %153 = vector.load %arg4[%152, %c0_64, %c0_65] : memref<4x8x128xf32, #tpu.memory_space<vmem>>, vector<1x8x128xf32>
    %154 = vector.shape_cast %153 : vector<1x8x128xf32> to vector<8x128xf32>
    %155 = vector.shape_cast %149 : vector<8x128xf32> to vector<1x8x128xf32>
    tpu.vector_store %arg4[%152, %c0_64, %c0_65], %155 {strides = array<i32>} : memref<4x8x128xf32, #tpu.memory_space<vmem>>, vector<1x8x128xf32>,
    %c4_i32 = arith.constant 4 : i32
    return
  }
  func.func @transform_0(%arg0: i32) -> (i32, i32, i32) {
    %c0_i32 = arith.constant 0 : i32
    %c0_i32_0 = arith.constant 0 : i32
    %c0_i32_1 = arith.constant 0 : i32
    return %arg0, %c0_i32, %c0_i32_0 : i32, i32, i32
  }
  func.func @transform_1(%arg0: i32) -> (i32, i32) {
    %c0_i32 = arith.constant 0 : i32
    %c0_i32_0 = arith.constant 0 : i32
    %c0_i32_1 = arith.constant 0 : i32
    return %c0_i32, %c0_i32_0 : i32, i32
  }
  func.func @transform_2(%arg0: i32) -> (i32, i32) {
    %c0_i32 = arith.constant 0 : i32
    %c0_i32_0 = arith.constant 0 : i32
    %c0_i32_1 = arith.constant 0 : i32
    return %c0_i32, %c0_i32_0 : i32, i32
  }
  func.func @transform_3(%arg0: i32) -> (i32, i32, i32) {
    %c0_i32 = arith.constant 0 : i32
    %c0_i32_0 = arith.constant 0 : i32
    %c0_i32_1 = arith.constant 0 : i32
    return %arg0, %c0_i32, %c0_i32_0 : i32, i32, i32
  }
}

module attributes {stable_mosaic.version = 11 : i64} {
  func.func @_proj_kernel(%arg0: i32, %arg1: i32, %arg2: memref<4x8x128xf32, #tpu.memory_space<vmem>>, %arg3: memref<128x128xf32, #tpu.memory_space<vmem>>, %arg4: memref<8x128xf32, #tpu.memory_space<vmem>>, %arg5: memref<4x8x128xf32, #tpu.memory_space<vmem>>) attributes {dimension_semantics = [#tpu.dimension_semantics<parallel>, #tpu.dimension_semantics<parallel>], iteration_bounds = array<i64: 2, 1>, scalar_prefetch = 0 : i64, scratch_operands = 0 : i64, tpu.core_type = #tpu.core_type<tc>, window_params = [{transform_indices = @transform_0, window_bounds = array<i64: 4, 8, 128>}, {transform_indices = @transform_1, window_bounds = array<i64: 128, 128>}, {transform_indices = @transform_2, window_bounds = array<i64: 8, 128>}, {transform_indices = @transform_3, window_bounds = array<i64: 4, 8, 128>}]} {
    %c0 = arith.constant 0 : index
    %c0_0 = arith.constant 0 : index
    %c0_1 = arith.constant 0 : index
    %0 = vector.load %arg2[%c0, %c0_0, %c0_1] : memref<4x8x128xf32, #tpu.memory_space<vmem>>, vector<4x8x128xf32>
    %1 = vector.shape_cast %0 : vector<4x8x128xf32> to vector<32x128xf32>
    %c0_2 = arith.constant 0 : index
    %c0_3 = arith.constant 0 : index
    %2 = vector.load %arg3[%c0_2, %c0_3] : memref<128x128xf32, #tpu.memory_space<vmem>>, vector<128x128xf32>
    %cst = arith.constant dense<0.000000e+00> : vector<32x128xf32>
    %3 = tpu.matmul %1, %2, %cst {dimension_numbers = #tpu.dot_dimension_numbers<[1], [0], [0], [1], [0, 0, 1, 1], [], []>} : vector<32x128xf32>, vector<128x128xf32>, vector<32x128xf32> -> vector<32x128xf32>
    %4 = vector.shape_cast %3 : vector<32x128xf32> to vector<4x8x128xf32>
    %c0_4 = arith.constant 0 : index
    %c0_5 = arith.constant 0 : index
    %5 = vector.load %arg4[%c0_4, %c0_5] : memref<8x128xf32, #tpu.memory_space<vmem>>, vector<8x128xf32>
    %6 = vector.shape_cast %5 : vector<8x128xf32> to vector<1x8x128xf32>
    %7 = vector.broadcast %6 : vector<1x8x128xf32> to vector<4x8x128xf32>
    %8 = arith.addf %4, %7 : vector<4x8x128xf32>
    %c0_6 = arith.constant 0 : index
    %c0_7 = arith.constant 0 : index
    %c0_8 = arith.constant 0 : index
    %9 = vector.load %arg5[%c0_6, %c0_7, %c0_8] : memref<4x8x128xf32, #tpu.memory_space<vmem>>, vector<4x8x128xf32>
    tpu.vector_store %arg5[%c0_6, %c0_7, %c0_8], %8 {strides = array<i32>} : memref<4x8x128xf32, #tpu.memory_space<vmem>>, vector<4x8x128xf32>,
    return
  }
  func.func @transform_0(%arg0: i32, %arg1: i32) -> (i32, i32, i32) {
    %c0_i32 = arith.constant 0 : i32
    %c0_i32_0 = arith.constant 0 : i32
    %c0_i32_1 = arith.constant 0 : i32
    return %arg0, %c0_i32, %c0_i32_0 : i32, i32, i32
  }
  func.func @transform_1(%arg0: i32, %arg1: i32) -> (i32, i32) {
    %c0_i32 = arith.constant 0 : i32
    %c0_i32_0 = arith.constant 0 : i32
    return %c0_i32, %arg1 : i32, i32
  }
  func.func @transform_2(%arg0: i32, %arg1: i32) -> (i32, i32) {
    %c0_i32 = arith.constant 0 : i32
    %c0_i32_0 = arith.constant 0 : i32
    return %c0_i32, %arg1 : i32, i32
  }
  func.func @transform_3(%arg0: i32, %arg1: i32) -> (i32, i32, i32) {
    %c0_i32 = arith.constant 0 : i32
    %c0_i32_0 = arith.constant 0 : i32
    return %arg0, %c0_i32, %arg1 : i32, i32, i32
  }
}

</mosaic_0001>

<bundles_post_ra>
// kernel: decoder_forward.3
= control target key start
LH: loop header
LB: loop body
LE: loop exit
PB: predicated region body
PF: predicated region fallthrough
CT: control target
= control target key end

     0   :  { %s634_s12 = smov 0   ;;  %s636_s13 = smov 0   ;;  %s731_s0 = inlined_call_operand.vmem [shape: f32[8,8,128], index: 0, kind: input, shape index: {}]   ;;  %s732_s1 = inlined_call_operand.vmem [shape: f32[128,128], index: 1, kind: input, shape index: {}]   ;;  %s733_s2 = inlined_call_operand.vmem [shape: f32[8,128], index: 2, kind: input, shape index: {}]   ;;  %s734_s3 = inlined_call_operand.vmem [shape: f32[8,8,128], index: 3, kind: output, shape index: {}]  }
   0x1   :  { %s638_s14 = smov 0  }
   0x2 LB: > { %s25_s15 = sadd.s32 1, %s608_s13  ;;  %p453_p0 = scmp.ge.s32.totalorder %s612_s14, 1  ;;  %s612_s14 = sphi %s638_s14, %s13_s14   ;;  %s608_s13 = sphi %s636_s13, %s736_s13   ;;  %s604_s12 = sphi %s634_s12, %s735_s12  }
   0x3   : > { %p27_p1 = scmp.ge.s32.totalorder %s25_s15, 2  ;;  %p170_p2 = scmp.lt.s32.totalorder %s612_s14, 3 }
   0x5   : > { %s738_s15 = smov (%p27_p1, %s25_s15), 0  ;;  %p171_p3 = pnand %p453_p0, %p170_p2 }
   0x6   : > { %v232_v0 = vld [vmem:[%s732_s1] sm:$0xff] (!%p171_p3)  ;;  %v233_v1 = vld [vmem:[%s732_s1 + $0x8] sm:$0xff] (!%p171_p3)  ;;  %v234_v2 = vld [vmem:[%s732_s1 + $0x10] sm:$0xff] (!%p171_p3)  ;;  %s454_s22 = sshll.u32 (!%p171_p3), %s604_s12, 2 }
   0x7   : > { %174 = sbr.rel (%p171_p3) target bundleno = 258 (0x102), region = 32  ;;  %v518_v3 = vpack.c.bf16 (!%p171_p3), %v233_v1, %v232_v0  ;;  %v235_v4 = vld [vmem:[%s732_s1 + $0x18] sm:$0xff] (!%p171_p3)  ;;  %p206_p4 = scmp.lt.s32.totalorder (!%p171_p3), %s454_s22, 7  ;;  %v236_v6 = vld [vmem:[%s732_s1 + $0x20] sm:$0xff] (!%p171_p3)  ;;  %v237_v7 = vld [vmem:[%s732_s1 + $0x28] sm:$0xff] (!%p171_p3) }
   0x8   : > { %v522_v5 = vpack.c.bf16 (!%p171_p3), %v235_v4, %v234_v2  ;;  %v526_v8 = vpack.c.bf16 (!%p171_p3), %v237_v7, %v236_v6  ;;  %v238_v9 = vld [vmem:[%s732_s1 + $0x30] sm:$0xff] (!%p171_p3)  ;;  %v239_v10 = vld [vmem:[%s732_s1 + $0x38] sm:$0xff] (!%p171_p3)  ;;  %v240_v14 = vld [vmem:[%s732_s1 + $0x40] sm:$0xff] (!%p171_p3) }
   0x9   : > { %519 = vmatprep.subr.bf16.mxu0 (!%p171_p3), %v518_v3  ;;  %550 = vmatprep.subr.bf16.mxu1 (!%p171_p3), %v518_v3  ;;  %v530_v13 = vpack.c.bf16 (!%p171_p3), %v239_v10, %v238_v9  ;;  %v241_v15 = vld [vmem:[%s732_s1 + $0x48] sm:$0xff] (!%p171_p3)  ;;  %v242_v17 = vld [vmem:[%s732_s1 + $0x50] sm:$0xff] (!%p171_p3)  ;;  %v243_v18 = vld [vmem:[%s732_s1 + $0x58] sm:$0xff] (!%p171_p3) }
   0xa   : > { %521 = vmatpush3.bf16.msra.mxu0 (!%p171_p3), %v518_v3  ;;  %558 = vmatpush3.bf16.msra.mxu1 (!%p171_p3), %v518_v3  ;;  %v534_v16 = vpack.c.bf16 (!%p171_p3), %v241_v15, %v240_v14  ;;  %v538_v19 = vpack.c.bf16 (!%p171_p3), %v243_v18, %v242_v17  ;;  %v244_v20 = vld [vmem:[%s732_s1 + $0x60] sm:$0xff] (!%p171_p3)  ;;  %v245_v21 = vld [vmem:[%s732_s1 + $0x68] sm:$0xff] (!%p171_p3)  ;;  %v246_v23 = vld [vmem:[%s732_s1 + $0x70] sm:$0xff] (!%p171_p3) }
   0xb   : > { %523 = vmatprep.subr.bf16.mxu0 (!%p171_p3), %v522_v5  ;;  %551 = vmatprep.subr.bf16.mxu1 (!%p171_p3), %v522_v5  ;;  %v542_v22 = vpack.c.bf16 (!%p171_p3), %v245_v21, %v244_v20  ;;  %v247_v24 = vld [vmem:[%s732_s1 + $0x78] sm:$0xff] (!%p171_p3)  ;;  %v333_v28 = vld [vmem:[%s733_s2] sm:$0xff] (!%p171_p3) }
   0xc   : > { %v546_v25 = vpack.c.bf16 (!%p171_p3), %v247_v24, %v246_v23 }
   0xe   : > { %s740_s22 = smov (!%p206_p4, %s454_s22), 7  ;;  %525 = vmatpush3.bf16.msra.mxu0 %v522_v5  ;;  %559 = vmatpush3.bf16.msra.mxu1 %v522_v5 }
   0xf   : > { %s455_s29 = sshll.u32 %s740_s22, 3  ;;  %527 = vmatprep.subr.bf16.mxu0 %v526_v8  ;;  %552 = vmatprep.subr.bf16.mxu1 %v526_v8 }
  0x10   : > { %s684_s9 = scalar_lea.vmem %s731_s0, %s455_s29  ;;  %s226_s8 = scalar_lea.vmem %s734_s3, %s455_s29 }
  0x11   : > { %v228_v11 = vld [vmem:[%s684_s9] sm:$0xff]  ;;  %v230_v12 = vld [vmem:[%s684_s9 + $0x10] sm:$0xff]  ;;  %v229_v26 = vld [vmem:[%s684_s9 + $0x8] sm:$0xff] }
  0x12   : > { %512 = vmatprep.mubr.f32.mxu0 %v228_v11  ;;  %515 = vmatprep.mubr.f32.mxu1 %v230_v12  ;;  %v231_v27 = vld [vmem:[%s684_s9 + $0x18] sm:$0xff] }
  0x13   : > { %529 = vmatpush3.bf16.msra.mxu0 %v526_v8  ;;  %560 = vmatpush3.bf16.msra.mxu1 %v526_v8 }
  0x14   : > { %531 = vmatprep.subr.bf16.mxu0 %v530_v13  ;;  %553 = vmatprep.subr.bf16.mxu1 %v530_v13 }
  0x17   : > { %533 = vmatpush3.bf16.msra.mxu0 %v530_v13  ;;  %561 = vmatpush3.bf16.msra.mxu1 %v530_v13 }
  0x18   : > { %535 = vmatprep.subr.bf16.mxu0 %v534_v16  ;;  %554 = vmatprep.subr.bf16.mxu1 %v534_v16 }
  0x1b   : > { %537 = vmatpush3.bf16.msra.mxu0 %v534_v16  ;;  %562 = vmatpush3.bf16.msra.mxu1 %v534_v16 }
  0x1c   : > { %539 = vmatprep.subr.bf16.mxu0 %v538_v19  ;;  %555 = vmatprep.subr.bf16.mxu1 %v538_v19 }
  0x1f   : > { %541 = vmatpush3.bf16.msra.mxu0 %v538_v19  ;;  %563 = vmatpush3.bf16.msra.mxu1 %v538_v19 }
  0x20   : > { %543 = vmatprep.subr.bf16.mxu0 %v542_v22  ;;  %556 = vmatprep.subr.bf16.mxu1 %v542_v22 }
  0x23   : > { %545 = vmatpush3.bf16.msra.mxu0 %v542_v22  ;;  %564 = vmatpush3.bf16.msra.mxu1 %v542_v22 }
  0x24   : > { %547 = vmatprep.subr.bf16.mxu0 %v546_v25  ;;  %557 = vmatprep.subr.bf16.mxu1 %v546_v25 }
  0x27   : > { %549 = vmatpush3.bf16.msra.mxu0 %v546_v25  ;;  %565 = vmatpush3.bf16.msra.mxu1 %v546_v25 }
  0x2a   : > { %513 = vmatmul.mubr.f32.vlgmr.msra.gmra.mrb[0].mxu0 %v229_v26  ;;  %516 = vmatmul.mubr.f32.vlgmr.msra.gmra.mrb[0].mxu1 %v231_v27 }
  0xfd   : > { %v514_v29 = vpop.f32.mrb[0].mxu0  ;;  %v517_v30 = vpop.f32.mrb[0].mxu1 }
  0xfe   : > { %v314_v31 = vpop.f32.mrb[1].mxu0  ;;  %v324_v32 = vpop.f32.mrb[1].mxu1  ;;  %v335_v35 = vadd.f32 %v514_v29, %v333_v28  ;;  %v337_v36 = vadd.f32 %v517_v30, %v333_v28 }
  0xff   : > { %v334_v33 = vadd.f32 %v333_v28, %v314_v31  ;;  %v336_v34 = vadd.f32 %v333_v28, %v324_v32 }
 0x100   : > { %339 = vst [vmem:[%s226_s8 + $0x8] sm:$0xff] %v335_v35  ;;  %341 = vst [vmem:[%s226_s8 + $0x18] sm:$0xff] %v337_v36 }
 0x101   : > { %338 = vst [vmem:[%s226_s8] sm:$0xff] %v334_v33  ;;  %340 = vst [vmem:[%s226_s8 + $0x10] sm:$0xff] %v336_v34 }
 0x102 PF: > { %s13_s14 = sadd.s32 1, %s612_s14   ;;  %s735_s12 = smov %s608_s13 }
 0x103   : > { %p10_p5 = scmp.ge.s32.totalorder %s13_s14, 4   ;;  %s736_s13 = smov %s738_s15 }
 0x105   :  { %12 = sbr.rel (!%p10_p5) target bundleno = 2 (0x2), region = 68 }

// kernel: decoder_forward.2
= control target key start
LH: loop header
LB: loop body
LE: loop exit
PB: predicated region body
PF: predicated region fallthrough
CT: control target
= control target key end

     0   :  { %s1427_s12 = smov 0   ;;  %s1871_s0 = inlined_call_operand.vmem [shape: f32[8,8,512], index: 0, kind: input, shape index: {}]   ;;  %s1872_s1 = inlined_call_operand.vmem [shape: f32[8,128], index: 1, kind: input, shape index: {}]   ;;  %s1873_s2 = inlined_call_operand.vmem [shape: f32[128,512], index: 2, kind: input, shape index: {}]   ;;  %s1874_s3 = inlined_call_operand.vmem [shape: f32[8,8,128], index: 3, kind: output, shape index: {}]  }
   0x1 LB: > { %s1026_s13 = sadd.s32 4294967295, %s1403_s12   ;;  %p1030_p0 = scmp.ge.s32.totalorder %s1403_s12, 1  ;;  %s1403_s12 = sphi %s1427_s12, %s13_s12  }
   0x2   : > { %p139_p1 = scmp.lt.s32.totalorder %s1403_s12, 3 }
   0x4   : > { %p140_p2 = pnand %p1030_p0, %p139_p1 }
   0x5   : > { %s1031_s14 = sshll.u32 (!%p140_p2), %s1026_s13, 2  ;;  %p1036_p4 = scmp.ne.s32.totalorder (!%p140_p2), %s1026_s13, 0 }
   0x6   : > { %143 = sbr.rel (%p140_p2) target bundleno = 1089 (0x441), region = 32  ;;  %p165_p3 = scmp.lt.s32.totalorder (!%p140_p2), %s1031_s14, 7 }
   0xd   : > { %s1876_s14 = smov (!%p165_p3, %s1031_s14), 7  ;;  %180 = sbr.rel (%p1036_p4) target bundleno = 20 (0x14), region = 36 }
   0xe   : > { %s1066_s15 = sshll.u32 %s1876_s14, 5  ;;  %s1035_s16 = sshll.u32 %s1876_s14, 3  ;;  %v181_v0 = vld [vmem:[%s1872_s1] sm:$0xff] (!%p1036_p4)  ;;  %v1405_v1 = vmov (!%p1036_p4), 0.0  }
   0xf   : > { %s1438_s19 = scalar_lea.vmem %s1871_s0, %s1066_s15  ;;  %s1443_s22 = scalar_lea.vmem %s1874_s3, %s1035_s16  ;;  %182 = vst [vmem:[#allocation2] sm:$0xff] (!%p1036_p4), %v181_v0  ;;  %183 = vst [vmem:[#allocation3] sm:$0xff] (!%p1036_p4), %v1405_v1 }
  0x14 PF: > { %v185_v2 = vld [vmem:[%s1873_s2 + $0x8] sm:$0xff]  ;;  %v184_v4 = vld [vmem:[%s1873_s2] sm:$0xff]  ;;  %v1406_v9 = vmov 0.0   ;;  %v187_v21 = vld [vmem:[%s1873_s2 + $0x18] sm:$0xff] }
  0x15   : > { %v189_v3 = vld [vmem:[%s1873_s2 + $0x28] sm:$0xff]  ;;  %v188_v6 = vld [vmem:[%s1873_s2 + $0x20] sm:$0xff]  ;;  %317 = vmatprep.mubr.f32.mxu0 %v1406_v9  ;;  %388 = vmatprep.mubr.f32.mxu1 %v1406_v9  ;;  %v191_v22 = vld [vmem:[%s1873_s2 + $0x38] sm:$0xff] }
  0x16   : > { %v1457_v5 = vpack.c.bf16 %v189_v3, %v185_v2  ;;  %v193_v7 = vld [vmem:[%s1873_s2 + $0x48] sm:$0xff]  ;;  %v1470_v10 = vpack.c.bf16 %v188_v6, %v184_v4  ;;  %v192_v12 = vld [vmem:[%s1873_s2 + $0x40] sm:$0xff]  ;;  %v1511_v24 = vpack.c.bf16 %v191_v22, %v187_v21  ;;  %v186_v25 = vld [vmem:[%s1873_s2 + $0x10] sm:$0xff] }
  0x17   : > { %v197_v8 = vld [vmem:[%s1873_s2 + $0x68] sm:$0xff]  ;;  %v196_v13 = vld [vmem:[%s1873_s2 + $0x60] sm:$0xff]  ;;  %v190_v26 = vld [vmem:[%s1873_s2 + $0x30] sm:$0xff] }
  0x18   : > { %v1472_v11 = vpack.c.bf16 %v197_v8, %v193_v7  ;;  %v201_v14 = vld [vmem:[%s1873_s2 + $0x88] sm:$0xff]  ;;  %1068 = vmatprep.subr.bf16.mxu0 %v1457_v5  ;;  %v1488_v16 = vpack.c.bf16 %v196_v13, %v192_v12  ;;  %v200_v17 = vld [vmem:[%s1873_s2 + $0x80] sm:$0xff]  ;;  %v1519_v27 = vpack.c.bf16 %v190_v26, %v186_v25  ;;  %1100 = vmatprep.subr.bf16.mxu1 %v1511_v24  ;;  %v195_v29 = vld [vmem:[%s1873_s2 + $0x58] sm:$0xff] }
  0x19   : > { %v205_v15 = vld [vmem:[%s1873_s2 + $0xa8] sm:$0xff]  ;;  %1070 = vmatpush1.bf16.msra.mxu0 %v1470_v10  ;;  %v204_v18 = vld [vmem:[%s1873_s2 + $0xa0] sm:$0xff]  ;;  %v199_v30 = vld [vmem:[%s1873_s2 + $0x78] sm:$0xff] }
  0x1a   : > { %1072 = vmatprep.subr.bf16.mxu0 %v1472_v11  ;;  %v1497_v19 = vpack.c.bf16 %v205_v15, %v201_v14  ;;  %v209_v20 = vld [vmem:[%s1873_s2 + $0xc8] sm:$0xff]  ;;  %v1522_v28 = vpack.c.bf16 %v204_v18, %v200_v17  ;;  %v194_v31 = vld [vmem:[%s1873_s2 + $0x50] sm:$0xff]  ;;  %v208_v33 = vld [vmem:[%s1873_s2 + $0xc0] sm:$0xff]  ;;  %1102 = vmatpush1.bf16.msra.mxu1 %v1519_v27  ;;  %v1544_v35 = vpack.c.bf16 %v199_v30, %v195_v29 }
  0x1b   : > { %v213_v23 = vld [vmem:[%s1873_s2 + $0xe8] sm:$0xff]  ;;  %v212_v34 = vld [vmem:[%s1873_s2 + $0xe0] sm:$0xff]  ;;  %v198_v36 = vld [vmem:[%s1873_s2 + $0x70] sm:$0xff] }
  0x1c   : > { %v1535_v32 = vpack.c.bf16 %v213_v23, %v209_v20  ;;  %v217_v37 = vld [vmem:[%s1873_s2 + $0x108] sm:$0xff]  ;;  %v1555_v39 = vpack.c.bf16 %v198_v36, %v194_v31  ;;  %v203_v40 = vld [vmem:[%s1873_s2 + $0x98] sm:$0xff]  ;;  %1104 = vmatprep.subr.bf16.mxu1 %v1544_v35  ;;  %v202_v42 = vld [vmem:[%s1873_s2 + $0x90] sm:$0xff]  ;;  %v1571_v44 = vpack.c.bf16 %v212_v34, %v208_v33 }
  0x1d   : > { %1074 = vmatpush1.bf16.msra.mxu0 %v1488_v16  ;;  %v221_v38 = vld [vmem:[%s1873_s2 + $0x128] sm:$0xff]  ;;  %v207_v41 = vld [vmem:[%s1873_s2 + $0xb8] sm:$0xff]  ;;  %v206_v43 = vld [vmem:[%s1873_s2 + $0xb0] sm:$0xff] }
  0x1e   : > { %1076 = vmatprep.subr.bf16.mxu0 %v1497_v19  ;;  %v216_v45 = vld [vmem:[%s1873_s2 + $0x100] sm:$0xff]  ;;  %v1579_v47 = vpack.c.bf16 %v207_v41, %v203_v40  ;;  %v1582_v48 = vpack.c.bf16 %v221_v38, %v217_v37  ;;  %1106 = vmatpush1.bf16.msra.mxu1 %v1555_v39  ;;  %v225_v49 = vld [vmem:[%s1873_s2 + $0x148] sm:$0xff]  ;;  %v1588_v50 = vpack.c.bf16 %v206_v43, %v202_v42  ;;  %v211_v51 = vld [vmem:[%s1873_s2 + $0xd8] sm:$0xff] }
  0x1f   : > { %v220_v46 = vld [vmem:[%s1873_s2 + $0x120] sm:$0xff]  ;;  %v215_v52 = vld [vmem:[%s1873_s2 + $0xf8] sm:$0xff]  ;;  %v229_v53 = vld [vmem:[%s1873_s2 + $0x168] sm:$0xff] }
  0x20   : > { %1108 = vmatprep.subr.bf16.mxu1 %v1579_v47  ;;  %v1600_v54 = vpack.c.bf16 %v215_v52, %v211_v51  ;;  %v210_v55 = vld [vmem:[%s1873_s2 + $0xd0] sm:$0xff]  ;;  %v1609_v57 = vpack.c.bf16 %v220_v46, %v216_v45  ;;  %v219_v58 = vld [vmem:[%s1873_s2 + $0x118] sm:$0xff]  ;;  %v1618_v60 = vpack.c.bf16 %v229_v53, %v225_v49  ;;  %v224_v61 = vld [vmem:[%s1873_s2 + $0x140] sm:$0xff] }
  0x21   : > { %1078 = vmatpush1.bf16.msra.mxu0 %v1522_v28  ;;  %v214_v56 = vld [vmem:[%s1873_s2 + $0xf0] sm:$0xff]  ;;  %v223_v59 = vld [vmem:[%s1873_s2 + $0x138] sm:$0xff]  ;;  %v228_v62 = vld [vmem:[%s1873_s2 + $0x160] sm:$0xff] }
  0x22   : > { %1080 = vmatprep.subr.bf16.mxu0 %v1535_v32  ;;  %1110 = vmatpush1.bf16.msra.mxu1 %v1588_v50  ;;  %v233_v63 = vld [vmem:[%s1873_s2 + $0x188] sm:$0xff]  ;;  %v1630_v0 = vpack.c.bf16 %v214_v56, %v210_v55  ;;  %v1636_v2 = vpack.c.bf16 %v223_v59, %v219_v58  ;;  %v218_v3 = vld [vmem:[%s1873_s2 + $0x110] sm:$0xff]  ;;  %v227_v6 = vld [vmem:[%s1873_s2 + $0x158] sm:$0xff]  ;;  %v1651_v8 = vpack.c.bf16 %v228_v62, %v224_v61 }
  0x23   : > { %v237_v1 = vld [vmem:[%s1873_s2 + $0x1a8] sm:$0xff]  ;;  %1112 = vmatprep.subr.bf16.mxu1 %v1600_v54  ;;  %v222_v4 = vld [vmem:[%s1873_s2 + $0x130] sm:$0xff]  ;;  %v231_v7 = vld [vmem:[%s1873_s2 + $0x178] sm:$0xff] }
  0x24   : > { %v1654_v12 = vpack.c.bf16 %v237_v1, %v233_v63  ;;  %v232_v13 = vld [vmem:[%s1873_s2 + $0x180] sm:$0xff]  ;;  %v241_v15 = vld [vmem:[%s1873_s2 + $0x1c8] sm:$0xff]  ;;  %v1666_v17 = vpack.c.bf16 %v222_v4, %v218_v3  ;;  %v1672_v20 = vpack.c.bf16 %v231_v7, %v227_v6  ;;  %v226_v21 = vld [vmem:[%s1873_s2 + $0x150] sm:$0xff] }
  0x25   : > { %1082 = vmatpush1.bf16.msra.mxu0 %v1571_v44  ;;  %v236_v14 = vld [vmem:[%s1873_s2 + $0x1a0] sm:$0xff]  ;;  %v245_v18 = vld [vmem:[%s1873_s2 + $0x1e8] sm:$0xff]  ;;  %v230_v22 = vld [vmem:[%s1873_s2 + $0x170] sm:$0xff] }
  0x26   : > { %1084 = vmatprep.subr.bf16.mxu0 %v1582_v48  ;;  %1114 = vmatpush1.bf16.msra.mxu1 %v1630_v0  ;;  %v235_v23 = vld [vmem:[%s1873_s2 + $0x198] sm:$0xff]  ;;  %v1687_v26 = vpack.c.bf16 %v236_v14, %v232_v13  ;;  %v1690_v29 = vpack.c.bf16 %v245_v18, %v241_v15  ;;  %v240_v30 = vld [vmem:[%s1873_s2 + $0x1c0] sm:$0xff]  ;;  %v1699_v33 = vpack.c.bf16 %v230_v22, %v226_v21  ;;  %v234_v36 = vld [vmem:[%s1873_s2 + $0x190] sm:$0xff] }
  0x27   : > { %1116 = vmatprep.subr.bf16.mxu1 %v1636_v2  ;;  %v239_v25 = vld [vmem:[%s1873_s2 + $0x1b8] sm:$0xff]  ;;  %v244_v31 = vld [vmem:[%s1873_s2 + $0x1e0] sm:$0xff]  ;;  %v238_v37 = vld [vmem:[%s1873_s2 + $0x1b0] sm:$0xff] }
  0x28   : > { %v1702_v34 = vpack.c.bf16 %v239_v25, %v235_v23  ;;  %v243_v38 = vld [vmem:[%s1873_s2 + $0x1d8] sm:$0xff]  ;;  %v1717_v41 = vpack.c.bf16 %v244_v31, %v240_v30  ;;  %v1721_v42 = vpack.c.bf16 %v238_v37, %v234_v36  ;;  %v242_v45 = vld [vmem:[%s1873_s2 + $0x1d0] sm:$0xff]  ;;  %v248_v49 = vld [vmem:[#allocation2] sm:$0xff] }
  0x29   : > { %1086 = vmatpush1.bf16.msra.mxu0 %v1609_v57  ;;  %v247_v40 = vld [vmem:[%s1873_s2 + $0x1f8] sm:$0xff]  ;;  %v246_v46 = vld [vmem:[%s1873_s2 + $0x1f0] sm:$0xff]  ;;  %v249_v52 = vld [vmem:[%s1438_s19] sm:$0xff] }
  0x2a   : > { %1088 = vmatprep.subr.bf16.mxu0 %v1618_v60  ;;  %1118 = vmatpush1.bf16.msra.mxu1 %v1666_v17  ;;  %v1724_v43 = vpack.c.bf16 %v247_v40, %v243_v38  ;;  %v1734_v51 = vpack.c.bf16 %v246_v46, %v242_v45  ;;  %v250_v53 = vld [vmem:[%s1438_s19 + $0x8] sm:$0xff]  ;;  %v252_v63 = vld [vmem:[%s1438_s19 + $0x18] sm:$0xff]  ;;  %v251_v6 = vld [vmem:[%s1438_s19 + $0x10] sm:$0xff] }
  0x2b   : > { %1120 = vmatprep.subr.bf16.mxu1 %v1672_v20  ;;  %v418_v25 = vld [vmem:[#allocation3] sm:$0xff] }
  0x2d   : > { %1090 = vmatpush1.bf16.msra.mxu0 %v1651_v8 }
  0x2e   : > { %1092 = vmatprep.subr.bf16.mxu0 %v1654_v12  ;;  %1122 = vmatpush1.bf16.msra.mxu1 %v1699_v33 }
  0x2f   : > { %1124 = vmatprep.subr.bf16.mxu1 %v1702_v34 }
  0x31   : > { %1094 = vmatpush1.bf16.msra.mxu0 %v1687_v26 }
  0x32   : > { %1096 = vmatprep.subr.bf16.mxu0 %v1690_v29  ;;  %1126 = vmatpush1.bf16.msra.mxu1 %v1721_v42 }
  0x33   : > { %1128 = vmatprep.subr.bf16.mxu1 %v1724_v43 }
  0x35   : > { %1098 = vmatpush1.bf16.msra.mxu0 %v1717_v41 }
  0x36   : > { %1132 = vmatprep.subr.bf16.mxu0 %v1457_v5  ;;  %1130 = vmatpush1.bf16.msra.mxu1 %v1734_v51 }
  0x37   : > { %1164 = vmatprep.subr.bf16.mxu1 %v1511_v24 }
  0x38   : > { %318 = vmatmul.mubr.f32.vlgmr.msra.gmra.mrb[0].mxu0 %v248_v49 }
  0x39   : > { %1134 = vmatpush1.bf16.msra.mxu0 %v1470_v10  ;;  %497 = vmatprep.mubr.f32.mxu0 %v1406_v9 }
  0x3a   : > { %1136 = vmatprep.subr.bf16.mxu0 %v1472_v11  ;;  %389 = vmatmul.mubr.f32.vlgmr.msra.gmra.mrb[0].mxu1 %v248_v49 }
  0x3b   : > { %1166 = vmatpush1.bf16.msra.mxu1 %v1519_v27  ;;  %568 = vmatprep.mubr.f32.mxu1 %v1406_v9 }
  0x3c   : > { %1168 = vmatprep.subr.bf16.mxu1 %v1544_v35 }
  0x3d   : > { %1138 = vmatpush1.bf16.msra.mxu0 %v1488_v16 }
  0x3e   : > { %1140 = vmatprep.subr.bf16.mxu0 %v1497_v19 }
  0x3f   : > { %1170 = vmatpush1.bf16.msra.mxu1 %v1555_v39 }
  0x40   : > { %1172 = vmatprep.subr.bf16.mxu1 %v1579_v47 }
  0x41   : > { %1142 = vmatpush1.bf16.msra.mxu0 %v1522_v28 }
  0x42   : > { %1144 = vmatprep.subr.bf16.mxu0 %v1535_v32 }
  0x43   : > { %1174 = vmatpush1.bf16.msra.mxu1 %v1588_v50 }
  0x44   : > { %1176 = vmatprep.subr.bf16.mxu1 %v1600_v54 }
  0x45   : > { %1146 = vmatpush1.bf16.msra.mxu0 %v1571_v44 }
  0x46   : > { %1148 = vmatprep.subr.bf16.mxu0 %v1582_v48 }
  0x47   : > { %1178 = vmatpush1.bf16.msra.mxu1 %v1630_v0 }
  0x48   : > { %1180 = vmatprep.subr.bf16.mxu1 %v1636_v2 }
  0x49   : > { %1150 = vmatpush1.bf16.msra.mxu0 %v1609_v57 }
  0x4a   : > { %1152 = vmatprep.subr.bf16.mxu0 %v1618_v60 }
  0x4b   : > { %1182 = vmatpush1.bf16.msra.mxu1 %v1666_v17 }
  0x4c   : > { %1184 = vmatprep.subr.bf16.mxu1 %v1672_v20 }
  0x4d   : > { %1154 = vmatpush1.bf16.msra.mxu0 %v1651_v8 }
  0x4e   : > { %1156 = vmatprep.subr.bf16.mxu0 %v1654_v12 }
  0x4f   : > { %1186 = vmatpush1.bf16.msra.mxu1 %v1699_v33 }
  0x50   : > { %1188 = vmatprep.subr.bf16.mxu1 %v1702_v34 }
  0x51   : > { %1158 = vmatpush1.bf16.msra.mxu0 %v1687_v26 }
  0x52   : > { %1160 = vmatprep.subr.bf16.mxu0 %v1690_v29 }
  0x53   : > { %1190 = vmatpush1.bf16.msra.mxu1 %v1721_v42 }
  0x54   : > { %1192 = vmatprep.subr.bf16.mxu1 %v1724_v43 }
  0x55   : > { %1162 = vmatpush1.bf16.msra.mxu0 %v1717_v41 }
  0x56   : > { %1196 = vmatprep.subr.bf16.mxu0 %v1457_v5 }
  0x57   : > { %1194 = vmatpush1.bf16.msra.mxu1 %v1734_v51 }
  0x58   : > { %1228 = vmatprep.subr.bf16.mxu1 %v1511_v24 }
 0x10b   : > { %v319_v55 = vpop.f32.mrb[0].mxu0 }
 0x10c   : > { %v395_v56 = vadd.f32 %v319_v55, %v249_v52  ;;  %v321_v58 = vpop.f32.mrb[1].mxu0  ;;  %v1040_v52 = vld [vmem:[%s1438_s19 + $0x20] sm:$0xff] }
 0x10d   : > { %v396_v59 = vadd.f32 %v321_v58, %v250_v53  ;;  %v390_v1 = vpop.f32.mrb[0].mxu1  ;;  %v1041_v53 = vld [vmem:[%s1438_s19 + $0x28] sm:$0xff] }
 0x10e   : > { %v1037_v61 = vmul.f32 -1.442695, %v395_v56  ;;  %v392_v3 = vpop.f32.mrb[1].mxu1  ;;  %v397_v13 = vadd.f32 %v390_v1, %v251_v6  ;;  %v1042_v6 = vld [vmem:[%s1438_s19 + $0x30] sm:$0xff] }
 0x10f   : > { %v1038_v62 = vmul.f32 -1.442695, %v396_v59  ;;  %v398_v4 = vadd.f32 %v392_v3, %v252_v63  ;;  %v1043_v3 = vld [vmem:[%s1438_s19 + $0x38] sm:$0xff] }
 0x110   : > { %1333 = vpow2.f32 %v1037_v61 }
 0x111   : > { %1335 = vpow2.f32 %v1038_v62  ;;  %v1039_v7 = vmul.f32 -1.442695, %v398_v4 }
 0x113   : > { %1337 = vpow2.f32 %v1039_v7 }
 0x114   : > { %1339 = vtanh.f32 %v397_v13 }
 0x11a   : > { %v1334_v14 = vpop.eup %1333 }
 0x11b   : > { %v1336_v15 = vpop.eup %1335  ;;  %v402_v18 = vadd.f32 1.0, %v1334_v14 }
 0x11c   : > { %v408_v21 = vadd.f32 1.0, %v1336_v15 }
 0x11d   : > { %1341 = vrcp.f32 %v402_v18  ;;  %v1338_v22 = vpop.eup %1337 }
 0x11e   : > { %1343 = vrcp.f32 %v408_v21  ;;  %v1340_v23 = vpop.eup %1339  ;;  %v415_v31 = vadd.f32 1.0, %v1338_v22 }
 0x120   : > { %1345 = vrcp.f32 %v415_v31 }
 0x127   : > { %v1342_v30 = vpop.eup %1341 }
 0x128   : > { %v1344_v36 = vpop.eup %1343  ;;  %v420_v37 = vmul.f32 %v1342_v30, %v1340_v23 }
 0x129   : > { %v419_v38 = vmul.f32 %v1344_v36, %v418_v25 }
 0x12a   : > { %v1346_v45 = vpop.eup %1345 }
 0x12b   : > { %v1778_v40 = vadd.f32 %v420_v37, %v419_v38 }
 0x12d   : > { %1347 = vtanh.f32 %v1778_v40 }
 0x137   : > { %v1348_v46 = vpop.eup %1347 }
 0x138   : > { %v423_v49 = vmul.f32 %v1348_v46, %v1346_v45 }
 0x13a   : > { %426 = vst [vmem:[%s1443_s22] sm:$0xff] %v423_v49  ;;  %498 = vmatmul.mubr.f32.vlgmr.msra.gmra.mrb[2].mxu0 %v423_v49  ;;  %569 = vmatmul.mubr.f32.vlgmr.msra.gmra.mrb[2].mxu1 %v423_v49 }
 0x13b   : > { %1198 = vmatpush1.bf16.msra.mxu0 %v1470_v10  ;;  %1230 = vmatpush1.bf16.msra.mxu1 %v1519_v27 }
 0x13c   : > { %1200 = vmatprep.subr.bf16.mxu0 %v1472_v11  ;;  %1232 = vmatprep.subr.bf16.mxu1 %v1544_v35 }
 0x13d   : > { %678 = vmatprep.mubr.f32.mxu0 %v1406_v9  ;;  %749 = vmatprep.mubr.f32.mxu1 %v1406_v9 }
 0x13f   : > { %1202 = vmatpush1.bf16.msra.mxu0 %v1488_v16  ;;  %1234 = vmatpush1.bf16.msra.mxu1 %v1555_v39 }
 0x140   : > { %1204 = vmatprep.subr.bf16.mxu0 %v1497_v19  ;;  %1236 = vmatprep.subr.bf16.mxu1 %v1579_v47 }
 0x143   : > { %1206 = vmatpush1.bf16.msra.mxu0 %v1522_v28  ;;  %1238 = vmatpush1.bf16.msra.mxu1 %v1588_v50 }
 0x144   : > { %1208 = vmatprep.subr.bf16.mxu0 %v1535_v32  ;;  %1240 = vmatprep.subr.bf16.mxu1 %v1600_v54 }
 0x147   : > { %1210 = vmatpush1.bf16.msra.mxu0 %v1571_v44  ;;  %1242 = vmatpush1.bf16.msra.mxu1 %v1630_v0 }
 0x148   : > { %1212 = vmatprep.subr.bf16.mxu0 %v1582_v48  ;;  %1244 = vmatprep.subr.bf16.mxu1 %v1636_v2 }
 0x14b   : > { %1214 = vmatpush1.bf16.msra.mxu0 %v1609_v57  ;;  %1246 = vmatpush1.bf16.msra.mxu1 %v1666_v17 }
 0x14c   : > { %1216 = vmatprep.subr.bf16.mxu0 %v1618_v60  ;;  %1248 = vmatprep.subr.bf16.mxu1 %v1672_v20 }
 0x14f   : > { %1218 = vmatpush1.bf16.msra.mxu0 %v1651_v8  ;;  %1250 = vmatpush1.bf16.msra.mxu1 %v1699_v33 }
 0x150   : > { %1220 = vmatprep.subr.bf16.mxu0 %v1654_v12  ;;  %1252 = vmatprep.subr.bf16.mxu1 %v1702_v34 }
 0x153   : > { %1222 = vmatpush1.bf16.msra.mxu0 %v1687_v26  ;;  %1254 = vmatpush1.bf16.msra.mxu1 %v1721_v42 }
 0x154   : > { %1224 = vmatprep.subr.bf16.mxu0 %v1690_v29  ;;  %1256 = vmatprep.subr.bf16.mxu1 %v1724_v43 }
 0x157   : > { %1226 = vmatpush1.bf16.msra.mxu0 %v1717_v41  ;;  %1258 = vmatpush1.bf16.msra.mxu1 %v1734_v51 }
 0x158   : > { %1260 = vmatprep.subr.bf16.mxu0 %v1457_v5  ;;  %1292 = vmatprep.subr.bf16.mxu1 %v1511_v24 }
 0x20d   : > { %v499_v55 = vpop.f32.mrb[2].mxu0  ;;  %v570_v56 = vpop.f32.mrb[2].mxu1 }
 0x20e   : > { %v575_v58 = vadd.f32 %v1040_v52, %v499_v55  ;;  %v501_v59 = vpop.f32.mrb[3].mxu0  ;;  %v572_v61 = vpop.f32.mrb[3].mxu1  ;;  %v577_v5 = vadd.f32 %v1042_v6, %v570_v56 }
 0x20f   : > { %v576_v62 = vadd.f32 %v1041_v53, %v501_v59  ;;  %v578_v4 = vadd.f32 %v1043_v3, %v572_v61  ;;  %v1059_v61 = vld [vmem:[%s1438_s19 + $0x78] sm:$0xff] }
 0x210   : > { %v1044_v63 = vmul.f32 -1.442695, %v575_v58 }
 0x211   : > { %v1045_v1 = vmul.f32 -1.442695, %v576_v62  ;;  %v1046_v7 = vmul.f32 -1.442695, %v578_v4 }
 0x212   : > { %1349 = vpow2.f32 %v1044_v63  ;;  %v1058_v63 = vld [vmem:[%s1438_s19 + $0x70] sm:$0xff] }
 0x213   : > { %1351 = vpow2.f32 %v1045_v1 }
 0x214   : > { %1353 = vpow2.f32 %v1046_v7 }
 0x215   : > { %1355 = vtanh.f32 %v577_v5 }
 0x21c   : > { %v1350_v13 = vpop.eup %1349 }
 0x21d   : > { %v1352_v14 = vpop.eup %1351  ;;  %v582_v24 = vadd.f32 1.0, %v1350_v13 }
 0x21e   : > { %v588_v15 = vadd.f32 1.0, %v1352_v14  ;;  %v1354_v18 = vpop.eup %1353 }
 0x21f   : > { %1357 = vrcp.f32 %v582_v24  ;;  %v1356_v21 = vpop.eup %1355  ;;  %v595_v30 = vadd.f32 1.0, %v1354_v18 }
 0x220   : > { %1359 = vrcp.f32 %v588_v15 }
 0x221   : > { %1361 = vrcp.f32 %v595_v30 }
 0x229   : > { %v1358_v22 = vpop.eup %1357 }
 0x22a   : > { %v1360_v23 = vpop.eup %1359  ;;  %v600_v25 = vmul.f32 %v1358_v22, %v1356_v21 }
 0x22b   : > { %v599_v31 = vmul.f32 %v1360_v23, %v1778_v40  ;;  %v1362_v37 = vpop.eup %1361  ;;  %v1057_v40 = vld [vmem:[%s1438_s19 + $0x68] sm:$0xff] }
 0x22d   : > { %v1821_v36 = vadd.f32 %v600_v25, %v599_v31 }
 0x22f   : > { %1363 = vtanh.f32 %v1821_v36 }
 0x239   : > { %v1364_v38 = vpop.eup %1363 }
 0x23a   : > { %v603_v45 = vmul.f32 %v1364_v38, %v1362_v37 }
 0x23c   : > { %1047 = vst [vmem:[%s1443_s22 + $0x8] sm:$0xff] %v603_v45  ;;  %679 = vmatmul.mubr.f32.vlgmr.msra.gmra.mrb[4].mxu0 %v603_v45  ;;  %750 = vmatmul.mubr.f32.vlgmr.msra.gmra.mrb[4].mxu1 %v603_v45 }
 0x23d   : > { %1262 = vmatpush1.bf16.msra.mxu0 %v1470_v10  ;;  %1294 = vmatpush1.bf16.msra.mxu1 %v1519_v27  ;;  %v1049_v10 = vld [vmem:[%s1438_s19 + $0x48] sm:$0xff] }
 0x23e   : > { %1264 = vmatprep.subr.bf16.mxu0 %v1472_v11  ;;  %1296 = vmatprep.subr.bf16.mxu1 %v1544_v35 }
 0x23f   : > { %859 = vmatprep.mubr.f32.mxu0 %v1406_v9  ;;  %930 = vmatprep.mubr.f32.mxu1 %v1406_v9  ;;  %v1048_v9 = vld [vmem:[%s1438_s19 + $0x40] sm:$0xff] }
 0x241   : > { %1266 = vmatpush1.bf16.msra.mxu0 %v1488_v16  ;;  %1298 = vmatpush1.bf16.msra.mxu1 %v1555_v39 }
 0x242   : > { %1268 = vmatprep.subr.bf16.mxu0 %v1497_v19  ;;  %1300 = vmatprep.subr.bf16.mxu1 %v1579_v47 }
 0x245   : > { %1270 = vmatpush1.bf16.msra.mxu0 %v1522_v28  ;;  %1302 = vmatpush1.bf16.msra.mxu1 %v1588_v50 }
 0x246   : > { %1272 = vmatprep.subr.bf16.mxu0 %v1535_v32  ;;  %1304 = vmatprep.subr.bf16.mxu1 %v1600_v54 }
 0x249   : > { %1274 = vmatpush1.bf16.msra.mxu0 %v1571_v44  ;;  %1306 = vmatpush1.bf16.msra.mxu1 %v1630_v0  ;;  %v1051_v44 = vld [vmem:[%s1438_s19 + $0x58] sm:$0xff] }
 0x24a   : > { %1276 = vmatprep.subr.bf16.mxu0 %v1582_v48  ;;  %1308 = vmatprep.subr.bf16.mxu1 %v1636_v2  ;;  %v1050_v48 = vld [vmem:[%s1438_s19 + $0x50] sm:$0xff] }
 0x24d   : > { %1278 = vmatpush1.bf16.msra.mxu0 %v1609_v57  ;;  %1310 = vmatpush1.bf16.msra.mxu1 %v1666_v17 }
 0x24e   : > { %1280 = vmatprep.subr.bf16.mxu0 %v1618_v60  ;;  %1312 = vmatprep.subr.bf16.mxu1 %v1672_v20 }
 0x251   : > { %1282 = vmatpush1.bf16.msra.mxu0 %v1651_v8  ;;  %1314 = vmatpush1.bf16.msra.mxu1 %v1699_v33 }
 0x252   : > { %1284 = vmatprep.subr.bf16.mxu0 %v1654_v12  ;;  %1316 = vmatprep.subr.bf16.mxu1 %v1702_v34 }
 0x255   : > { %1286 = vmatpush1.bf16.msra.mxu0 %v1687_v26  ;;  %1318 = vmatpush1.bf16.msra.mxu1 %v1721_v42 }
 0x256   : > { %1288 = vmatprep.subr.bf16.mxu0 %v1690_v29  ;;  %1320 = vmatprep.subr.bf16.mxu1 %v1724_v43 }
 0x259   : > { %1290 = vmatpush1.bf16.msra.mxu0 %v1717_v41  ;;  %1322 = vmatpush1.bf16.msra.mxu1 %v1734_v51  ;;  %v1056_v51 = vld [vmem:[%s1438_s19 + $0x60] sm:$0xff] }
 0x30f   : > { %v680_v11 = vpop.f32.mrb[4].mxu0  ;;  %v751_v16 = vpop.f32.mrb[4].mxu1 }
 0x310   : > { %v756_v19 = vadd.f32 %v1048_v9, %v680_v11  ;;  %v682_v27 = vpop.f32.mrb[5].mxu0  ;;  %v753_v28 = vpop.f32.mrb[5].mxu1  ;;  %v758_v54 = vadd.f32 %v1050_v48, %v751_v16 }
 0x311   : > { %v757_v32 = vadd.f32 %v1049_v10, %v682_v27  ;;  %v759_v47 = vadd.f32 %v1051_v44, %v753_v28 }
 0x312   : > { %v1052_v35 = vmul.f32 -1.442695, %v756_v19 }
 0x313   : > { %v1053_v39 = vmul.f32 -1.442695, %v757_v32  ;;  %v1054_v50 = vmul.f32 -1.442695, %v759_v47 }
 0x314   : > { %1365 = vpow2.f32 %v1052_v35 }
 0x315   : > { %1367 = vpow2.f32 %v1053_v39 }
 0x316   : > { %1369 = vpow2.f32 %v1054_v50 }
 0x317   : > { %1371 = vtanh.f32 %v758_v54 }
 0x31e   : > { %v1366_v57 = vpop.eup %1365 }
 0x31f   : > { %v1368_v60 = vpop.eup %1367  ;;  %v763_v0 = vadd.f32 1.0, %v1366_v57 }
 0x320   : > { %v769_v2 = vadd.f32 1.0, %v1368_v60  ;;  %v1370_v8 = vpop.eup %1369 }
 0x321   : > { %1373 = vrcp.f32 %v763_v0  ;;  %v1372_v12 = vpop.eup %1371  ;;  %v776_v29 = vadd.f32 1.0, %v1370_v8 }
 0x322   : > { %1375 = vrcp.f32 %v769_v2 }
 0x323   : > { %1377 = vrcp.f32 %v776_v29 }
 0x32b   : > { %v1374_v17 = vpop.eup %1373 }
 0x32c   : > { %v1376_v20 = vpop.eup %1375  ;;  %v781_v26 = vmul.f32 %v1374_v17, %v1372_v12 }
 0x32d   : > { %v780_v33 = vmul.f32 %v1376_v20, %v1821_v36  ;;  %v1378_v41 = vpop.eup %1377 }
 0x32f   : > { %v782_v34 = vadd.f32 %v781_v26, %v780_v33 }
 0x331   : > { %1379 = vtanh.f32 %v782_v34 }
 0x33b   : > { %v1380_v42 = vpop.eup %1379 }
 0x33c   : > { %v784_v43 = vmul.f32 %v1380_v42, %v1378_v41 }
 0x33e   : > { %1055 = vst [vmem:[%s1443_s22 + $0x10] sm:$0xff] %v784_v43  ;;  %860 = vmatmul.mubr.f32.vlgmr.msra.gmra.mrb[6].mxu0 %v784_v43  ;;  %931 = vmatmul.mubr.f32.vlgmr.msra.gmra.mrb[6].mxu1 %v784_v43 }
 0x411   : > { %v861_v46 = vpop.f32.mrb[6].mxu0  ;;  %v932_v49 = vpop.f32.mrb[6].mxu1 }
 0x412   : > { %v937_v52 = vadd.f32 %v1056_v51, %v861_v46  ;;  %v863_v53 = vpop.f32.mrb[7].mxu0  ;;  %v934_v55 = vpop.f32.mrb[7].mxu1  ;;  %v939_v3 = vadd.f32 %v1058_v63, %v932_v49 }
 0x413   : > { %v938_v56 = vadd.f32 %v1057_v40, %v863_v53  ;;  %v940_v62 = vadd.f32 %v1059_v61, %v934_v55 }
 0x414   : > { %v1060_v58 = vmul.f32 -1.442695, %v937_v52 }
 0x415   : > { %v1061_v59 = vmul.f32 -1.442695, %v938_v56  ;;  %v1062_v1 = vmul.f32 -1.442695, %v940_v62 }
 0x416   : > { %1381 = vpow2.f32 %v1060_v58 }
 0x417   : > { %1383 = vpow2.f32 %v1061_v59 }
 0x418   : > { %1385 = vpow2.f32 %v1062_v1 }
 0x419   : > { %1387 = vtanh.f32 %v939_v3 }
 0x420   : > { %v1382_v4 = vpop.eup %1381 }
 0x421   : > { %v1384_v6 = vpop.eup %1383  ;;  %v944_v7 = vadd.f32 1.0, %v1382_v4 }
 0x422   : > { %v950_v5 = vadd.f32 1.0, %v1384_v6  ;;  %v1386_v13 = vpop.eup %1385 }
 0x423   : > { %1389 = vrcp.f32 %v944_v7  ;;  %v1388_v14 = vpop.eup %1387  ;;  %v957_v21 = vadd.f32 1.0, %v1386_v13 }
 0x424   : > { %1391 = vrcp.f32 %v950_v5 }
 0x425   : > { %1393 = vrcp.f32 %v957_v21 }
 0x42d   : > { %v1390_v24 = vpop.eup %1389 }
 0x42e   : > { %v1392_v15 = vpop.eup %1391  ;;  %v962_v18 = vmul.f32 %v1390_v24, %v1388_v14 }
 0x42f   : > { %v961_v22 = vmul.f32 %v1392_v15, %v782_v34  ;;  %v1394_v25 = vpop.eup %1393 }
 0x431   : > { %v963_v23 = vadd.f32 %v962_v18, %v961_v22 }
 0x433   : > { %1395 = vtanh.f32 %v963_v23  ;;  %966 = vst [vmem:[#allocation3] sm:$0xff] %v963_v23 }
 0x43d   : > { %v1396_v30 = vpop.eup %1395 }
 0x43e   : > { %v965_v31 = vmul.f32 %v1396_v30, %v1394_v25 }
 0x440   : > { %967 = vst [vmem:[#allocation2] sm:$0xff] %v965_v31  ;;  %1063 = vst [vmem:[%s1443_s22 + $0x18] sm:$0xff] %v965_v31 }
 0x441 PF: > { %s13_s12 = sadd.s32 1, %s1403_s12  }
 0x442   : > { %p10_p5 = scmp.ge.s32.totalorder %s13_s12, 4  }
 0x444   :  { %12 = sbr.rel (!%p10_p5) target bundleno = 1 (0x1), region = 72 }

</bundles_post_ra>
